<compile_context>
chip_gen: v7x
topology: tpu7x:2x2x1
jax: 0.10.0
libtpu: 0.0.40
codegen_flags: <defaults>
</compile_context>

<pallas_src>
import functools
import math

import jax
import jax.numpy as jnp
import numpy as np
from jax.experimental import pallas as pl
from jax.experimental.pallas import tpu as pltpu


def _round_up(x: int, m: int) -> int:
    return ((x + m - 1) // m) * m


# ------------------------- fused Pallas kernel -------------------------

def _hms2_fused_kernel(p_ref, cw_ref, cb_ref, dw_ref, db_ref, o_ref, acc_ref,
                       *, m_blk, pad_rows):
    """conv(im2col matmul) + ReLU -> global-average-pool -> Linear, fused.

    Grid = (batch, m_chunk).  The m_chunk axis is a reduction ("arbitrary"):
    per-(batch, channel) sums live sublane-stacked in the VMEM scratch
    `acc_ref`; the dense head runs on the final reduction step only.
    """
    m = pl.program_id(1)

    @pl.when(m == 0)
    def _():
        acc_ref[...] = jnp.zeros_like(acc_ref)

    # uint8 -> bf16 directly (integers 0..255 are exact in bf16); the 1/255
    # scale is folded into the bf16 conv weights.  MXU matmul, f32 accumulate.
    x = p_ref[0].astype(jnp.bfloat16)                                # (m_blk, KPAD)
    e = jnp.dot(x, cw_ref[...], preferred_element_type=jnp.float32)  # (m_blk, CPAD)
    e = jnp.maximum(e + cb_ref[...], 0.0)                            # bias + ReLU, f32

    # Partial global-average-pool: accumulate sublane-stacked channel sums.
    # Pure VPU adds (no per-step cross-sublane reduce).
    cpad = e.shape[-1]
    acc_ref[...] += jnp.sum(e.reshape(m_blk // 8, 8, cpad), axis=0)  # (8, CPAD)

    @pl.when(m == pl.num_programs(1) - 1)
    def _():
        sums = jnp.sum(acc_ref[...], axis=0, keepdims=True)          # (1, CPAD)
        if pad_rows:
            # Each all-zero padded patch row contributed exactly relu(conv_b);
            # remove that bias from the pooled sum (exact, done once).
            sums = sums - float(pad_rows) * jnp.maximum(cb_ref[...], 0.0)
        # 1/m_valid is folded into dw (bf16); explicit bf16 head matmul.
        logits = jnp.dot(sums.astype(jnp.bfloat16), dw_ref[...],
                         preferred_element_type=jnp.float32) + db_ref[...]
        o_ref[0] = logits.astype(o_ref.dtype)                        # (1, CLS_PAD)


# ------------------------- HMS2 geometry checks -------------------------

def _check_axis_tiling_equivalence(extent, tile_size, crop, stride, step, tile_count):
    """Assert the HMS2 cropped tiles exactly tile [0, extent // stride).

    Under this condition the tiled conv (_Hms2Convolutional forward) is
    bit-identical to the whole-image conv, so the tiling can be replaced by
    the Pallas grid without changing forward values.
    """
    pos = 0
    for t in range(tile_count):
        c = t * step
        size = min(tile_size, extent - c)
        if size <= 0 or size % stride != 0:
            raise ValueError(
                "HMS2 edge tile is not emb_stride-aligned; the tiled conv would "
                "drop boundary pixels differently from the whole-image conv.")
        e = size // stride
        lo = crop if t != 0 else 0
        hi = e - crop if t != tile_count - 1 else e
        if hi - lo < 1:
            raise ValueError("HMS2 tile is fully cropped away; unsupported config.")
        if c % stride != 0 or c // stride + lo != pos:
            raise ValueError("HMS2 cropped tiles do not tile the embedding map.")
        pos = c // stride + hi
    if pos != extent // stride:
        raise ValueError("HMS2 cropped tiles do not cover the embedding map.")


# ------------------------- Hms2 forward -------------------------

@functools.partial(
    jax.jit,
    static_argnames=("tile_size", "emb_crop_size", "emb_stride_size", "m_block_rows"))
def hms2_forward(image_batch, params, *, tile_size, emb_crop_size,
                 emb_stride_size, m_block_rows=None):
    """Hms2Model.forward (forward only; the custom autograd backward is not needed)."""
    n, h, w, cin = image_batch.shape
    s = emb_stride_size
    crop = emb_crop_size
    conv_w, conv_b = params["conv_w"], params["conv_b"]
    dense_w, dense_b = params["dense_w"], params["dense_b"]
    cout = conv_w.shape[-1]
    classes = dense_w.shape[-1]

    # ---- HMS2 tiling geometry (_Hms2Convolutional) + equivalence preconditions ----
    overlap = crop * s * 2
    if tile_size <= overlap:
        raise ValueError("tile_size must exceed 2 * emb_crop_size * emb_stride_size.")
    step = tile_size - overlap
    tile_w = max(0, int(math.ceil((w - tile_size) / step))) + 1
    tile_h = max(0, int(math.ceil((h - tile_size) / step))) + 1
    if h % s != 0 or w % s != 0 or tile_size % s != 0:
        raise ValueError("image size and tile_size must be emb_stride-aligned.")
    _check_axis_tiling_equivalence(w, tile_size, crop, s, step, tile_w)
    _check_axis_tiling_equivalence(h, tile_size, crop, s, step, tile_h)
    # TODO(synk): non-stride-aligned HMS2 configs change boundary semantics; we
    # raise above instead of silently diverging from the PyTorch tiled conv.
    # TODO(synk): loader_module.hint_future_accesses / prefetch_next and the
    # _BackgroundTileCache are host-side scheduling / caching optimizations with
    # no effect on forward values; intentionally not reproduced.

    ho, wo = h // s, w // s
    k = s * s * cin
    m_valid = ho * wo

    # ---- padded layouts: lane-dense K / channels, sublane-aligned patch chunks ----
    kpad = _round_up(k, 128)           # no-op for real HMS2 (s=32, cin=3 -> K=3072)
    cpad = 128 if cout <= 128 else _round_up(cout, 256)   # fill 256-wide MXU when big
    cls_pad = _round_up(classes, 128)

    if m_block_rows is None:
        # Per-row VMEM working set: double-buffered uint8 patch block, its bf16
        # cast, and the f32 conv-output tile.  ~20 MiB budget leaves headroom
        # for the weight operands under the 32 MiB scoped VMEM limit (v7x-safe).
        bytes_per_row = 2 * kpad + 2 * kpad + 4 * cpad
        m_blk = max(32, min(4096, (20 * 1024 * 1024) // bytes_per_row))
        m_blk = max(32, (m_blk // 32) * 32)
        m_blk = min(m_blk, _round_up(m_valid, 32))
    else:
        m_blk = _round_up(m_block_rows, 32)
    m_pad = _round_up(m_valid, m_blk)
    m_steps = m_pad // m_blk
    pad_rows = m_pad - m_valid

    # loader_module + im2col: one relayout pass over the whole image, staying
    # uint8, with the K/M zero-padding folded into the same pass so the
    # rewritten `patches` array is already lane-aligned.
    patches = image_batch.reshape(n, ho, s, wo, s, cin)
    patches = patches.transpose(0, 1, 3, 2, 4, 5).reshape(n, m_valid, k)
    if pad_rows or kpad != k:
        patches = jnp.pad(patches, ((0, 0), (0, pad_rows), (0, kpad - k)))

    # conv weights: flatten to (K, Cout), fold 1/255, pad K/channels, cast bf16.
    cw = conv_w.reshape(k, cout).astype(jnp.float32) * (1.0 / 255.0)
    cw = jnp.pad(cw, ((0, kpad - k), (0, cpad - cout))).astype(jnp.bfloat16)
    cb = jnp.pad(conv_b.reshape(1, cout).astype(jnp.float32), ((0, 0), (0, cpad - cout)))
    # dense head: fold the global-average-pool 1/m_valid into the weight, bf16.
    dw = dense_w.astype(jnp.float32) * (1.0 / float(m_valid))
    dw = jnp.pad(dw, ((0, cpad - cout), (0, cls_pad - classes))).astype(jnp.bfloat16)
    db = jnp.pad(dense_b.reshape(1, classes).astype(jnp.float32),
                 ((0, 0), (0, cls_pad - classes)))

    kernel = functools.partial(_hms2_fused_kernel, m_blk=m_blk, pad_rows=pad_rows)

    out = pl.pallas_call(
        kernel,
        out_shape=jax.ShapeDtypeStruct((n, 1, cls_pad), jnp.float32),
        grid_spec=pltpu.PrefetchScalarGridSpec(
            num_scalar_prefetch=0,
            grid=(n, m_steps),
            in_specs=[
                pl.BlockSpec((1, m_blk, kpad), lambda i, m: (i, m, 0)),  # uint8 patches
                pl.BlockSpec((kpad, cpad), lambda i, m: (0, 0)),         # conv weight (bf16)
                pl.BlockSpec((1, cpad), lambda i, m: (0, 0)),            # conv bias (f32)
                pl.BlockSpec((cpad, cls_pad), lambda i, m: (0, 0)),      # dense weight (bf16)
                pl.BlockSpec((1, cls_pad), lambda i, m: (0, 0)),         # dense bias (f32)
            ],
            out_specs=pl.BlockSpec((1, 1, cls_pad), lambda i, m: (i, 0, 0)),
            scratch_shapes=[pltpu.VMEM((8, cpad), jnp.float32)],
        ),
        compiler_params=pltpu.CompilerParams(
            # batch shards across v7x's 2 TensorCores; the spatial-chunk axis is
            # the pooled reduction.  Scoped VMEM capped with v7x's 64 MiB
            # physical budget in mind.
            dimension_semantics=("parallel", "arbitrary"),
            vmem_limit_bytes=32 * 1024 * 1024,
        ),
    )(patches, cw, cb, dw, db)

    return out[:, 0, :classes]


# ------------------------- pure-JAX references -------------------------

def reference_forward_f32(image_batch, params):
    """Exact module math in f32 (x / 255 in f32, f32 conv + dense weights)."""
    conv_w, conv_b = params["conv_w"], params["conv_b"]
    dense_w, dense_b = params["dense_w"], params["dense_b"]
    s = conv_w.shape[0]
    cout = conv_w.shape[-1]
    n, h, w, cin = image_batch.shape
    ho, wo = h // s, w // s
    x = image_batch.astype(jnp.float32) / 255.0
    p = x.reshape(n, ho, s, wo, s, cin).transpose(0, 1, 3, 2, 4, 5)
    p = p.reshape(n, ho * wo, s * s * cin)
    emb = jnp.maximum(jnp.einsum("nmk,kc->nmc", p, conv_w.reshape(-1, cout)) + conv_b, 0.0)
    pooled = emb.mean(axis=1)
    return pooled @ dense_w + dense_b


def reference_forward_matched(image_batch, params):
    """Reference mirroring the kernel's numerics (bf16 matmuls, folded scales)."""
    conv_w, conv_b = params["conv_w"], params["conv_b"]
    dense_w, dense_b = params["dense_w"], params["dense_b"]
    s = conv_w.shape[0]
    cout = conv_w.shape[-1]
    n, h, w, cin = image_batch.shape
    ho, wo = h // s, w // s
    m = ho * wo
    p = image_batch.reshape(n, ho, s, wo, s, cin).transpose(0, 1, 3, 2, 4, 5)
    p = p.reshape(n, m, s * s * cin).astype(jnp.bfloat16)
    wmat = (conv_w.reshape(-1, cout).astype(jnp.float32) / 255.0).astype(jnp.bfloat16)
    emb = jnp.einsum("nmk,kc->nmc", p, wmat, preferred_element_type=jnp.float32)
    emb = jnp.maximum(emb + conv_b.astype(jnp.float32), 0.0)
    sums = emb.sum(axis=1)                                            # f32 channel sums
    dwf = (dense_w.astype(jnp.float32) / float(m)).astype(jnp.bfloat16)
    logits = jnp.dot(sums.astype(jnp.bfloat16), dwf,
                     preferred_element_type=jnp.float32) + dense_b.astype(jnp.float32)
    return logits


# ------------------------- main -------------------------

if __name__ == "__main__":
    # Small shapes: batch=2, Cin=3, H=W=28, tile_size=16, emb_crop_size=1,
    # emb_stride_size=2 -> 2x2 HMS2 tile grid, 14x14 embedding map, hidden=32,
    # 8 classes.  m_block_rows=128 is deliberately small so the fused pooled
    # reduction runs over multiple grid steps AND exercises the padded-row
    # relu(bias) correction (196 valid rows -> 256 padded rows).
    N, H, W, CIN = 2, 28, 28, 3
    TILE_SIZE, EMB_CROP, EMB_STRIDE = 16, 1, 2
    HIDDEN, CLASSES = 32, 8

    key = jax.random.PRNGKey(0)
    k_img, k_cw, k_cb, k_dw, k_db = jax.random.split(key, 5)

    image_batch = jax.random.randint(
        k_img, (N, H, W, CIN), 0, 256, dtype=jnp.int32).astype(jnp.uint8)

    params = {
        "conv_w": jax.random.normal(k_cw, (EMB_STRIDE, EMB_STRIDE, CIN, HIDDEN), jnp.float32) * 0.1,
        "conv_b": jax.random.normal(k_cb, (HIDDEN,), jnp.float32) * 0.1,
        "dense_w": jax.random.normal(k_dw, (HIDDEN, CLASSES), jnp.float32) * 0.1,
        "dense_b": jax.random.normal(k_db, (CLASSES,), jnp.float32) * 0.1,
    }

    out = hms2_forward(
        image_batch, params,
        tile_size=TILE_SIZE, emb_crop_size=EMB_CROP, emb_stride_size=EMB_STRIDE,
        m_block_rows=128,
    )
    out = jax.block_until_ready(out)

    ref_matched = jax.block_until_ready(reference_forward_matched(image_batch, params))
    ref_f32 = jax.block_until_ready(reference_forward_f32(image_batch, params))

    # tight check against the kernel's bf16-matmul math, loose check against
    # the pure-f32 module semantics (bf16 weight rounding only).
    np.testing.assert_allclose(np.asarray(out), np.asarray(ref_matched), rtol=5e-3, atol=5e-3)
    np.testing.assert_allclose(np.asarray(out), np.asarray(ref_f32), rtol=2e-2, atol=2e-2)

    print("KERNEL_OK")
</pallas_src>

<mosaic_0001>
module attributes {stable_mosaic.version = 11 : i64} {
  func.func @_hms2_fused_kernel(%arg0: i32, %arg1: i32, %arg2: memref<1x128x128xi8, #tpu.memory_space<vmem>>, %arg3: memref<128x128xbf16, #tpu.memory_space<vmem>>, %arg4: memref<1x128xf32, #tpu.memory_space<vmem>>, %arg5: memref<128x128xbf16, #tpu.memory_space<vmem>>, %arg6: memref<1x128xf32, #tpu.memory_space<vmem>>, %arg7: memref<1x1x128xf32, #tpu.memory_space<vmem>>, %arg8: memref<8x128xf32, #tpu.memory_space<vmem>>) attributes {dimension_semantics = [#tpu.dimension_semantics<parallel>, #tpu.dimension_semantics<arbitrary>], iteration_bounds = array<i64: 2, 2>, scalar_prefetch = 0 : i64, scratch_operands = 1 : i64, tpu.core_type = #tpu.core_type<tc>, window_params = [{transform_indices = @transform_0, window_bounds = array<i64: 1, 128, 128>}, {pipeline_mode = #tpu.pipeline_mode<synchronous>, transform_indices = @transform_1, window_bounds = array<i64: 128, 128>}, {pipeline_mode = #tpu.pipeline_mode<synchronous>, transform_indices = @transform_2, window_bounds = array<i64: 1, 128>}, {pipeline_mode = #tpu.pipeline_mode<synchronous>, transform_indices = @transform_3, window_bounds = array<i64: 128, 128>}, {pipeline_mode = #tpu.pipeline_mode<synchronous>, transform_indices = @transform_4, window_bounds = array<i64: 1, 128>}, {transform_indices = @transform_5, window_bounds = array<i64: 1, 1, 128>}]} {
    %c0_i32 = arith.constant 0 : i32
    %0 = arith.cmpi eq, %arg1, %c0_i32 : i32
    %1 = arith.extui %0 : i1 to i32
    %c0_i32_0 = arith.constant 0 : i32
    %2 = arith.cmpi ne, %1, %c0_i32_0 : i32
    scf.if %2 {
      %cst_14 = arith.constant 0.000000e+00 : f32
      %21 = vector.broadcast %cst_14 : f32 to vector<8x128xf32>
      %c0_15 = arith.constant 0 : index
      %c0_16 = arith.constant 0 : index
      %22 = vector.load %arg8[%c0_15, %c0_16] : memref<8x128xf32, #tpu.memory_space<vmem>>, vector<8x128xf32>
      tpu.vector_store %arg8[%c0_15, %c0_16], %21 {strides = array<i32>} : memref<8x128xf32, #tpu.memory_space<vmem>>, vector<8x128xf32>,
    } else {
    }
    %c0 = arith.constant 0 : index
    %c0_1 = arith.constant 0 : index
    %c0_2 = arith.constant 0 : index
    %3 = vector.load %arg2[%c0, %c0_1, %c0_2] : memref<1x128x128xi8, #tpu.memory_space<vmem>>, vector<1x128x128xi8>
    %4 = vector.shape_cast %3 : vector<1x128x128xi8> to vector<128x128xi8>
    %5 = arith.uitofp %4 : vector<128x128xi8> to vector<128x128xbf16>
    %c0_3 = arith.constant 0 : index
    %c0_4 = arith.constant 0 : index
    %6 = vector.load %arg3[%c0_3, %c0_4] : memref<128x128xbf16, #tpu.memory_space<vmem>>, vector<128x128xbf16>
    %cst = arith.constant dense<0.000000e+00> : vector<128x128xf32>
    %7 = tpu.matmul %5, %6, %cst {dimension_numbers = #tpu.dot_dimension_numbers<[1], [0], [0], [1], [0, 0, 1, 1], [], []>} : vector<128x128xbf16>, vector<128x128xbf16>, vector<128x128xf32> -> vector<128x128xf32>
    %c0_5 = arith.constant 0 : index
    %c0_6 = arith.constant 0 : index
    %8 = vector.load %arg4[%c0_5, %c0_6] : memref<1x128xf32, #tpu.memory_space<vmem>>, vector<1x128xf32>
    %9 = vector.broadcast %8 : vector<1x128xf32> to vector<128x128xf32>
    %10 = arith.addf %7, %9 : vector<128x128xf32>
    %cst_7 = arith.constant 0.000000e+00 : f32
    %11 = vector.broadcast %cst_7 : f32 to vector<128x128xf32>
    %12 = arith.maximumf %10, %11 : vector<128x128xf32>
    %c0_8 = arith.constant 0 : index
    %c0_9 = arith.constant 0 : index
    %13 = vector.load %arg8[%c0_8, %c0_9] : memref<8x128xf32, #tpu.memory_space<vmem>>, vector<8x128xf32>
    %14 = vector.shape_cast %12 : vector<128x128xf32> to vector<16x8x128xf32>
    %cst_10 = arith.constant dense<0.000000e+00> : vector<8x128xf32>
    %15 = vector.multi_reduction <add>, %14, %cst_10 [0] : vector<16x8x128xf32> to vector<8x128xf32>
    %16 = arith.addf %13, %15 : vector<8x128xf32>
    %c0_11 = arith.constant 0 : index
    %c0_12 = arith.constant 0 : index
    %17 = vector.load %arg8[%c0_11, %c0_12] : memref<8x128xf32, #tpu.memory_space<vmem>>, vector<8x128xf32>
    tpu.vector_store %arg8[%c0_11, %c0_12], %16 {strides = array<i32>} : memref<8x128xf32, #tpu.memory_space<vmem>>, vector<8x128xf32>,
    %c1_i32 = arith.constant 1 : i32
    %18 = arith.cmpi eq, %arg1, %c1_i32 : i32
    %19 = arith.extui %18 : i1 to i32
    %c0_i32_13 = arith.constant 0 : i32
    %20 = arith.cmpi ne, %19, %c0_i32_13 : i32
    scf.if %20 {
      %c0_14 = arith.constant 0 : index
      %c0_15 = arith.constant 0 : index
      %21 = vector.load %arg8[%c0_14, %c0_15] : memref<8x128xf32, #tpu.memory_space<vmem>>, vector<8x128xf32>
      %cst_16 = arith.constant dense<0.000000e+00> : vector<128xf32>
      %22 = vector.multi_reduction <add>, %21, %cst_16 [0] : vector<8x128xf32> to vector<128xf32>
      %23 = vector.shape_cast %22 : vector<128xf32> to vector<1x128xf32>
      %c0_17 = arith.constant 0 : index
      %c0_18 = arith.constant 0 : index
      %24 = vector.load %arg4[%c0_17, %c0_18] : memref<1x128xf32, #tpu.memory_space<vmem>>, vector<1x128xf32>
      %cst_19 = arith.constant 0.000000e+00 : f32
      %25 = vector.broadcast %cst_19 : f32 to vector<1x128xf32>
      %26 = arith.maximumf %24, %25 : vector<1x128xf32>
      %cst_20 = arith.constant 6.000000e+01 : f32
      %27 = vector.broadcast %cst_20 : f32 to vector<1x128xf32>
      %28 = arith.mulf %27, %26 : vector<1x128xf32>
      %29 = arith.subf %23, %28 : vector<1x128xf32>
      %30 = arith.truncf %29 : vector<1x128xf32> to vector<1x128xbf16>
      %c0_21 = arith.constant 0 : index
      %c0_22 = arith.constant 0 : index
      %31 = vector.load %arg5[%c0_21, %c0_22] : memref<128x128xbf16, #tpu.memory_space<vmem>>, vector<128x128xbf16>
      %cst_23 = arith.constant dense<0.000000e+00> : vector<1x128xf32>
      %32 = tpu.matmul %30, %31, %cst_23 {dimension_numbers = #tpu.dot_dimension_numbers<[1], [0], [0], [1], [0, 0, 1, 1], [], []>} : vector<1x128xbf16>, vector<128x128xbf16>, vector<1x128xf32> -> vector<1x128xf32>
      %c0_24 = arith.constant 0 : index
      %c0_25 = arith.constant 0 : index
      %33 = vector.load %arg6[%c0_24, %c0_25] : memref<1x128xf32, #tpu.memory_space<vmem>>, vector<1x128xf32>
      %34 = arith.addf %32, %33 : vector<1x128xf32>
      %c0_26 = arith.constant 0 : index
      %c0_27 = arith.constant 0 : index
      %c0_28 = arith.constant 0 : index
      %35 = vector.load %arg7[%c0_26, %c0_27, %c0_28] : memref<1x1x128xf32, #tpu.memory_space<vmem>>, vector<1x1x128xf32>
      %36 = vector.shape_cast %35 : vector<1x1x128xf32> to vector<1x128xf32>
      %37 = vector.shape_cast %34 : vector<1x128xf32> to vector<1x1x128xf32>
      tpu.vector_store %arg7[%c0_26, %c0_27, %c0_28], %37 {strides = array<i32>} : memref<1x1x128xf32, #tpu.memory_space<vmem>>, vector<1x1x128xf32>,
    } else {
    }
    return
  }
  func.func @transform_0(%arg0: i32, %arg1: i32) -> (i32, i32, i32) {
    %c0_i32 = arith.constant 0 : i32
    %c0_i32_0 = arith.constant 0 : i32
    return %arg0, %arg1, %c0_i32 : i32, i32, i32
  }
  func.func @transform_1(%arg0: i32, %arg1: i32) -> (i32, i32) {
    %c0_i32 = arith.constant 0 : i32
    %c0_i32_0 = arith.constant 0 : i32
    %c0_i32_1 = arith.constant 0 : i32
    return %c0_i32, %c0_i32_0 : i32, i32
  }
  func.func @transform_2(%arg0: i32, %arg1: i32) -> (i32, i32) {
    %c0_i32 = arith.constant 0 : i32
    %c0_i32_0 = arith.constant 0 : i32
    %c0_i32_1 = arith.constant 0 : i32
    return %c0_i32, %c0_i32_0 : i32, i32
  }
  func.func @transform_3(%arg0: i32, %arg1: i32) -> (i32, i32) {
    %c0_i32 = arith.constant 0 : i32
    %c0_i32_0 = arith.constant 0 : i32
    %c0_i32_1 = arith.constant 0 : i32
    return %c0_i32, %c0_i32_0 : i32, i32
  }
  func.func @transform_4(%arg0: i32, %arg1: i32) -> (i32, i32) {
    %c0_i32 = arith.constant 0 : i32
    %c0_i32_0 = arith.constant 0 : i32
    %c0_i32_1 = arith.constant 0 : i32
    return %c0_i32, %c0_i32_0 : i32, i32
  }
  func.func @transform_5(%arg0: i32, %arg1: i32) -> (i32, i32, i32) {
    %c0_i32 = arith.constant 0 : i32
    %c0_i32_0 = arith.constant 0 : i32
    %c0_i32_1 = arith.constant 0 : i32
    return %arg0, %c0_i32, %c0_i32_0 : i32, i32, i32
  }
}

</mosaic_0001>

<bundles_post_ra>
// kernel: hms2_forward.1
= control target key start
LH: loop header
LB: loop body
LE: loop exit
PB: predicated region body
PF: predicated region fallthrough
CT: control target
= control target key end

     0   :  { %10 = vsyncpa [#allocation4], 0  ;;  %s1220_s0 = inlined_call_operand.vmem [shape: u8[2,256,128], index: 0, kind: input, shape index: {}]   ;;  %s1221_s1 = inlined_call_operand.vmem [shape: bf16[128,128], index: 1, kind: input, shape index: {}]   ;;  %s1222_s2 = inlined_call_operand.vmem [shape: f32[1,128], index: 2, kind: input, shape index: {}]   ;;  %s1223_s3 = inlined_call_operand.vmem [shape: bf16[128,128], index: 3, kind: input, shape index: {}]   ;;  %s1224_s4 = inlined_call_operand.vmem [shape: f32[1,128], index: 4, kind: input, shape index: {}]   ;;  %s1225_s5 = inlined_call_operand.hbm [shape: f32[2,1,128], index: 5, kind: output, shape index: {}]  }
   0x1   :  { %12 = vsyncpa [#allocation4 + $0x1], 0  ;;  %s1020_s18 = smov 0   ;;  %s1022_s19 = smov 0  }
   0x2   :  { %s1024_s20 = smov 0   ;;  %s1026_s21 = smov 0  }
   0x3   :  { %s1028_s22 = smov 0   ;;  %s1030_s23 = smov 0  }
   0x4   :  { %s1032_s24 = smov 0   ;;  %s1034_s25 = smov 0  }
   0x5 LB: > { %s677_s26 = sadd.s32 4294967295, %s984_s25   ;;  %s678_s27 = sadd.s32 4294967294, %s984_s25   ;;  %s984_s25 = sphi %s1034_s25, %s18_s25   ;;  %s980_s24 = sphi %s1032_s24, %s1234_s24   ;;  %s976_s23 = sphi %s1030_s23, %s1233_s23   ;;  %s972_s22 = sphi %s1028_s22, %s1232_s22   ;;  %s968_s21 = sphi %s1026_s21, %s1231_s21   ;;  %s964_s20 = sphi %s1024_s20, %s1230_s20   ;;  %s960_s19 = sphi %s1022_s19, %s1229_s19   ;;  %s956_s18 = sphi %s1020_s18, %s1228_s18  }
   0x6   : > { %s27_s28 = sadd.s32 1, %s976_s23  ;;  %s30_s29 = sadd.s32 1, %s980_s24 }
   0x7   : > { %p28_p0 = scmp.ge.s32.totalorder %s27_s28, 2  ;;  %p159_p1 = scmp.ne.s32.totalorder %s964_s20, %s960_s19 }
   0x8   : > { %p160_p2 = scmp.eq.s32.totalorder %s677_s26, 3  ;;  %p165_p4 = scmp.ne.s32.totalorder %s960_s19, %s956_s18 }
   0x9   : > { %s1236_s28 = smov (%p28_p0, %s27_s28), 0  ;;  %s1238_s29 = smov (!%p28_p0, %s30_s29), %s980_s24 }
   0xa   : > { %p1069_p3 = por %p160_p2, %p159_p1  ;;  %p32_p5 = scmp.ge.s32.totalorder %s1238_s29, 2 }
   0xb   : > { %p166_p6 = scmp.eq.s32.totalorder %s678_s27, 3  ;;  %p681_p7 = scmp.ge.s32.totalorder %s984_s25, 1 }
   0xc   : > { %p209_p8 = scmp.lt.s32.totalorder %s984_s25, 5  ;;  %s1240_s29 = smov (%p32_p5, %s1238_s29), 0 }
   0xd   : > { %p1079_p9 = por %p166_p6, %p165_p4  ;;  %s146_s7 = ssub.s32 %s980_s24, %s1240_s29 }
   0xe   : > { %p210_p10 = pnand %p681_p7, %p209_p8  ;;  %s149_s8 = sadd.s32 1, %s964_s20 }
   0xf   : > { %p147_p11 = scmp.eq.s32.totalorder %s146_s7, 0  ;;  %s238_s10 = sand.u32 (!%p210_p10), 1, %s960_s19  }
  0x10   : > { %213 = sbr.rel (%p210_p10) target bundleno = 578 (0x242), region = 40  ;;  %s682_s11 = sshll.u32 (!%p210_p10), %s968_s21, 2 }
  0x11   : > { %s1087_s9 = scalar_select %p147_p11, %s964_s20, %s149_s8  }
  0x12   : > { %p241_p12 = scmp.lt.s32.totalorder (!%p210_p10), %s972_s22, 1  ;;  %p243_p13 = scmp.lt.s32.totalorder (!%p210_p10), %s682_s11, 7 }
  0x13   : > { %s1100_s27 = scalar_lea.vmem (!%p210_p10), [#allocation3], %s238_s10  ;;  %p685_p0 = scmp.ne.s32.totalorder (!%p210_p10), %s968_s21, 0 }
  0x17   : > { %s242_s12 = scalar_select %p241_p12, %s972_s22, 1 }
  0x18   : > { %s1242_s11 = smov (!%p243_p13, %s682_s11), 7  ;;  %254 = sbr.rel (%p685_p0) target bundleno = 31 (0x1f), region = 44 }
  0x19   : > { %s683_s13 = sshll.u32 %s242_s12, 3  ;;  %v986_v0 = vmov (!%p685_p0), 0.0  }
  0x1a   : > { %s246_s14 = sadd.s32 %s683_s13, %s1242_s11  ;;  %255 = vst [vmem:[#allocation2] sm:$0xff] (!%p685_p0), %v986_v0 }
  0x1b   : > { %s684_s15 = sshll.u32 %s246_s14, 3 }
  0x1c   : > { %s1096_s26 = scalar_lea.vmem %s1220_s0, %s684_s15 }
  0x1f PF: > { %v874_v1 = vld [vmem:[%s1221_s1] sm:$0xff]   ;;  %v875_v2 = vld [vmem:[%s1221_s1 + $0x8] sm:$0xff]   ;;  %v876_v3 = vld [vmem:[%s1221_s1 + $0x10] sm:$0xff]   ;;  %p695_p1 = scmp.ne.s32.totalorder %s968_s21, 1 }
  0x20   : > { %732 = vmatprep.subr.bf16.mxu0 %v874_v1  ;;  %784 = vmatprep.subr.bf16.mxu1 %v874_v1  ;;  %v877_v4 = vld [vmem:[%s1221_s1 + $0x18] sm:$0xff]   ;;  %v256_v5 = vld [vmem:[%s1096_s26] sm:$0xff]  ;;  %v258_v6 = vld [vmem:[%s1096_s26 + $0x10] sm:$0xff]  ;;  %vm988_vm0 = vmmov (!%p695_p1), 0  }
  0x21   : > { %733 = vmatpush3.bf16.msra.mxu0 %v874_v1  ;;  %792 = vmatpush3.bf16.msra.mxu1 %v874_v1  ;;  %v260_v7 = vunpack.c.l.u8.bf16 %v256_v5  ;;  %v264_v8 = vunpack.c.l.u8.bf16 %v258_v6  ;;  %v878_v9 = vld [vmem:[%s1221_s1 + $0x20] sm:$0xff]   ;;  %v879_v10 = vld [vmem:[%s1221_s1 + $0x28] sm:$0xff]   ;;  %v880_v11 = vld [vmem:[%s1221_s1 + $0x30] sm:$0xff]   ;;  %v261_v15 = vunpack.c.h.u8.bf16 %v256_v5  ;;  %v265_v16 = vunpack.c.h.u8.bf16 %v258_v6 }
  0x22   : > { %734 = vmatprep.subr.bf16.mxu0 %v875_v2  ;;  %785 = vmatprep.subr.bf16.mxu1 %v875_v2  ;;  %v881_v12 = vld [vmem:[%s1221_s1 + $0x38] sm:$0xff]   ;;  %v257_v13 = vld [vmem:[%s1096_s26 + $0x8] sm:$0xff]  ;;  %v686_v21 = vld [vmem:[%s1222_s2] ss:$0 sm:$0xff] }
  0x23   : > { %748 = vmatprep.mubr.bf16.mxu0 %v260_v7  ;;  %756 = vmatprep.mubr.bf16.mxu1 %v264_v8  ;;  %v259_v14 = vld [vmem:[%s1096_s26 + $0x18] sm:$0xff]  ;;  %v262_v17 = vunpack.c.l.u8.bf16 %v257_v13  ;;  %v263_v19 = vunpack.c.h.u8.bf16 %v257_v13 }
  0x24   : > { %v266_v18 = vunpack.c.l.u8.bf16 %v259_v14  ;;  %v267_v20 = vunpack.c.h.u8.bf16 %v259_v14 }
  0x25   : > { %735 = vmatpush3.bf16.msra.mxu0 %v875_v2  ;;  %793 = vmatpush3.bf16.msra.mxu1 %v875_v2 }
  0x26   : > { %736 = vmatprep.subr.bf16.mxu0 %v876_v3  ;;  %786 = vmatprep.subr.bf16.mxu1 %v876_v3 }
  0x29   : > { %737 = vmatpush3.bf16.msra.mxu0 %v876_v3  ;;  %794 = vmatpush3.bf16.msra.mxu1 %v876_v3 }
  0x2a   : > { %738 = vmatprep.subr.bf16.mxu0 %v877_v4  ;;  %787 = vmatprep.subr.bf16.mxu1 %v877_v4 }
  0x2d   : > { %739 = vmatpush3.bf16.msra.mxu0 %v877_v4  ;;  %795 = vmatpush3.bf16.msra.mxu1 %v877_v4 }
  0x2e   : > { %740 = vmatprep.subr.bf16.mxu0 %v878_v9  ;;  %788 = vmatprep.subr.bf16.mxu1 %v878_v9 }
  0x31   : > { %741 = vmatpush3.bf16.msra.mxu0 %v878_v9  ;;  %796 = vmatpush3.bf16.msra.mxu1 %v878_v9 }
  0x32   : > { %742 = vmatprep.subr.bf16.mxu0 %v879_v10  ;;  %789 = vmatprep.subr.bf16.mxu1 %v879_v10 }
  0x35   : > { %743 = vmatpush3.bf16.msra.mxu0 %v879_v10  ;;  %797 = vmatpush3.bf16.msra.mxu1 %v879_v10 }
  0x36   : > { %744 = vmatprep.subr.bf16.mxu0 %v880_v11  ;;  %790 = vmatprep.subr.bf16.mxu1 %v880_v11 }
  0x39   : > { %745 = vmatpush3.bf16.msra.mxu0 %v880_v11  ;;  %798 = vmatpush3.bf16.msra.mxu1 %v880_v11 }
  0x3a   : > { %746 = vmatprep.subr.bf16.mxu0 %v881_v12  ;;  %791 = vmatprep.subr.bf16.mxu1 %v881_v12 }
  0x3d   : > { %747 = vmatpush3.bf16.msra.mxu0 %v881_v12  ;;  %799 = vmatpush3.bf16.msra.mxu1 %v881_v12 }
  0x40   : > { %749 = vmatmul.mubr.bf16.vlgmr.msra.gmra.mrb[0].mxu0 %v261_v15  ;;  %757 = vmatmul.mubr.bf16.vlgmr.msra.gmra.mrb[0].mxu1 %v265_v16 }
  0x41   : > { %752 = vmatprep.mubr.bf16.mxu0 %v262_v17  ;;  %760 = vmatprep.mubr.bf16.mxu1 %v266_v18 }
  0x48   : > { %753 = vmatmul.mubr.bf16.gmra.mrb[4].mxu0 %v263_v19  ;;  %761 = vmatmul.mubr.bf16.gmra.mrb[4].mxu1 %v267_v20  ;;  %v452_v20 = vld [vmem:[#allocation2] sm:$0xff] }
 0x113   : > { %v750_v22 = vpop.f32.mrb[0].mxu0  ;;  %v758_v23 = vpop.f32.mrb[0].mxu1 }
 0x114   : > { %v373_v24 = vpop.f32.mrb[1].mxu0  ;;  %v405_v25 = vpop.f32.mrb[1].mxu1  ;;  %v382_v31 = vadd.f32 %v750_v22, %v686_v21  ;;  %v414_v63 = vadd.f32 %v758_v23, %v686_v21 }
 0x115   : > { %v374_v26 = vadd.f32 %v686_v21, %v373_v24  ;;  %v751_v27 = vpop.f32.mrb[2].mxu0  ;;  %v759_v28 = vpop.f32.mrb[2].mxu1  ;;  %v406_v56 = vadd.f32 %v686_v21, %v405_v25  ;;  %v882_v24 = vld [vmem:[%s1223_s3] sm:$0xff] (!%p695_p1)   ;;  %v987_v25 = vmov (!%p695_p1), 0.0  }
 0x116   : > { %v376_v29 = vpop.f32.mrb[3].mxu0  ;;  %v408_v30 = vpop.f32.mrb[3].mxu1  ;;  %v385_v34 = vadd.f32 %v751_v27, %v686_v21  ;;  %v438_v36 = vmax.f32 %v382_v31, 0.0  ;;  %v417_v2 = vadd.f32 %v759_v28, %v686_v21  ;;  %v446_v5 = vmax.f32 %v414_v63, 0.0  ;;  %764 = vmatprep.subr.bf16.mxu0 (!%p695_p1), %v987_v25  ;;  %780 = vmatprep.mubr.msk.bf16.mxu0 (!%p695_p1), %vm988_vm0, %v987_v25 }
 0x117   : > { %v377_v32 = vadd.f32 %v686_v21, %v376_v29  ;;  %v436_v33 = vmax.f32 %v374_v26, 0.0  ;;  %v444_v61 = vmax.f32 %v406_v56, 0.0  ;;  %v409_v62 = vadd.f32 %v686_v21, %v408_v30  ;;  %765 = vmatpush3.bf16.msra.mxu0 (!%p695_p1), %v882_v24  ;;  %v884_v26 = vld [vmem:[%s1223_s3 + $0x10] sm:$0xff] (!%p695_p1)   ;;  %v885_v29 = vld [vmem:[%s1223_s3 + $0x18] sm:$0xff] (!%p695_p1)  }
 0x118   : > { %v439_v42 = vmax.f32 %v385_v34, 0.0  ;;  %v447_v7 = vmax.f32 %v417_v2, 0.0  ;;  %766 = vmatprep.subr.bf16.mxu0 (!%p695_p1), %v987_v25 }
 0x119   : > { %v437_v35 = vmax.f32 %v377_v32, 0.0  ;;  %v445_v3 = vmax.f32 %v409_v62, 0.0  ;;  %v886_v32 = vld [vmem:[%s1223_s3 + $0x20] sm:$0xff] (!%p695_p1)  }
 0x11b   : > { %v453_v37 = vadd.f32 %v437_v35, %v436_v33  ;;  %v754_v38 = vpop.f32.mrb[4].mxu0  ;;  %v762_v39 = vpop.f32.mrb[4].mxu1  ;;  %v481_v33 = vld [vmem:[%s1222_s2] sm:$0x1] (!%p695_p1) }
 0x11c   : > { %v389_v40 = vpop.f32.mrb[5].mxu0  ;;  %v421_v41 = vpop.f32.mrb[5].mxu1  ;;  %v398_v49 = vadd.f32 %v754_v38, %v686_v21  ;;  %v430_v11 = vadd.f32 %v762_v39, %v686_v21 }
 0x11d   : > { %v454_v43 = vadd.f32 %v453_v37, %v438_v36  ;;  %v390_v44 = vadd.f32 %v686_v21, %v389_v40  ;;  %v755_v45 = vpop.f32.mrb[6].mxu0  ;;  %v763_v46 = vpop.f32.mrb[6].mxu1  ;;  %v422_v4 = vadd.f32 %v686_v21, %v421_v41  ;;  %v482_v36 = vmax.f32 (!%p695_p1), %v481_v33, 0.0  ;;  %v887_v37 = vld [vmem:[%s1223_s3 + $0x28] sm:$0xff] (!%p695_p1)   ;;  %v888_v40 = vld [vmem:[%s1223_s3 + $0x30] sm:$0xff] (!%p695_p1)  }
 0x11e   : > { %v392_v47 = vpop.f32.mrb[7].mxu0  ;;  %v424_v48 = vpop.f32.mrb[7].mxu1  ;;  %v401_v54 = vadd.f32 %v755_v45, %v686_v21  ;;  %v442_v57 = vmax.f32 %v398_v49, 0.0  ;;  %v433_v14 = vadd.f32 %v763_v46, %v686_v21  ;;  %v450_v16 = vmax.f32 %v430_v11, 0.0 }
 0x11f   : > { %v440_v50 = vmax.f32 %v390_v44, 0.0  ;;  %v455_v51 = vadd.f32 %v454_v43, %v439_v42  ;;  %v393_v52 = vadd.f32 %v686_v21, %v392_v47  ;;  %v448_v9 = vmax.f32 %v422_v4, 0.0  ;;  %v889_v42 = vld [vmem:[%s1223_s3 + $0x38] sm:$0xff] (!%p695_p1)   ;;  %v502_v44 = vld [vmem:[%s1224_s4] sm:$0x1] (!%p695_p1) }
 0x120   : > { %v443_v59 = vmax.f32 %v401_v54, 0.0  ;;  %v425_v10 = vadd.f32 %v686_v21, %v424_v48  ;;  %v451_v18 = vmax.f32 %v433_v14, 0.0  ;;  %v883_v21 = vld [vmem:[%s1223_s3 + $0x8] sm:$0xff] (!%p695_p1)   ;;  %v483_v39 = vmul.f32 (!%p695_p1), 60.0, %v482_v36 }
 0x121   : > { %v456_v53 = vadd.f32 %v455_v51, %v440_v50  ;;  %v441_v55 = vmax.f32 %v393_v52, 0.0  ;;  %767 = vmatpush3.bf16.msra.mxu0 (!%p695_p1), %v883_v21 }
 0x122   : > { %v449_v15 = vmax.f32 %v425_v10, 0.0  ;;  %768 = vmatprep.subr.bf16.mxu0 (!%p695_p1), %v987_v25 }
 0x123   : > { %v457_v58 = vadd.f32 %v456_v53, %v441_v55 }
 0x125   : > { %v458_v60 = vadd.f32 %v457_v58, %v442_v57  ;;  %769 = vmatpush3.bf16.msra.mxu0 (!%p695_p1), %v884_v26 }
 0x126   : > { %770 = vmatprep.subr.bf16.mxu0 (!%p695_p1), %v987_v25 }
 0x127   : > { %v459_v0 = vadd.f32 %v458_v60, %v443_v59 }
 0x129   : > { %v460_v1 = vadd.f32 %v459_v0, %v444_v61  ;;  %771 = vmatpush3.bf16.msra.mxu0 (!%p695_p1), %v885_v29 }
 0x12a   : > { %772 = vmatprep.subr.bf16.mxu0 (!%p695_p1), %v987_v25 }
 0x12b   : > { %v461_v6 = vadd.f32 %v460_v1, %v445_v3 }
 0x12d   : > { %v462_v8 = vadd.f32 %v461_v6, %v446_v5  ;;  %773 = vmatpush3.bf16.msra.mxu0 (!%p695_p1), %v886_v32 }
 0x12e   : > { %774 = vmatprep.subr.bf16.mxu0 (!%p695_p1), %v987_v25 }
 0x12f   : > { %v463_v12 = vadd.f32 %v462_v8, %v447_v7 }
 0x131   : > { %v464_v13 = vadd.f32 %v463_v12, %v448_v9  ;;  %775 = vmatpush3.bf16.msra.mxu0 (!%p695_p1), %v887_v37 }
 0x132   : > { %776 = vmatprep.subr.bf16.mxu0 (!%p695_p1), %v987_v25 }
 0x133   : > { %v465_v17 = vadd.f32 %v464_v13, %v449_v15 }
 0x135   : > { %v466_v19 = vadd.f32 %v465_v17, %v450_v16  ;;  %473 = sbr.rel (%p695_p1) target bundleno = 554 (0x22a), region = 48  ;;  %777 = vmatpush3.bf16.msra.mxu0 (!%p695_p1), %v888_v40 }
 0x136   : > { %778 = vmatprep.subr.bf16.mxu0 (!%p695_p1), %v987_v25 }
 0x137   : > { %v467_v22 = vadd.f32 %v466_v19, %v451_v18 }
 0x139   : > { %v468_v23 = vadd.f32 %v467_v22, %v452_v20  ;;  %779 = vmatpush3.bf16.msra.mxu0 (!%p695_p1), %v889_v42 }
 0x13b   : > { %469 = vst [vmem:[#allocation2] sm:$0xff] %v468_v23 }
 0x142   : > { %v474_v27 = vld [vmem:[#allocation2] sm:$0xff] }
 0x143   : > { %v475_v28 = vrot.slane %v474_v27, 4 }
 0x145   : > { %v476_v30 = vadd.f32 %v475_v28, %v474_v27 }
 0x147   : > { %v477_v31 = vrot.slane %v476_v30, 2 }
 0x149   : > { %v478_v34 = vadd.f32 %v477_v31, %v476_v30 }
 0x14b   : > { %v479_v35 = vrot.slane %v478_v34, 1 }
 0x14d   : > { %v480_v38 = vadd.f32 %v479_v35, %v478_v34 }
 0x14f   : > { %v484_v41 = vsub.f32 %v480_v38, %v483_v39 }
 0x151   : > { %v485_v43 = vpack.c.bf16 %v484_v41, %v484_v41 }
 0x153   : > { %781 = vmatmul.mubr.bf16.vlgmr.msra.gmra.mrb[0].mxu0 %v485_v43 }
 0x226   : > { %v585_v45 = vpop.f32.mrb[0].mxu0 }
 0x227   : > { %v586_v46 = vadd.f32 %v585_v45, %v502_v44  ;;  %v782_v47 = vpop.f32.mrb[1].mxu0 }
 0x228   : > { %v588_v48 = vpop.f32.mrb[2].mxu0 }
 0x229   : > { %591 = vst [vmem:[%s1100_s27] sm:$0x1] %v586_v46  ;;  %v783_v49 = vpop.f32.mrb[3].mxu0 }
 0x22a PF: > { %s704_s16 = sshll.u32 %s972_s22, 4  ;;  %s605_s8 = sshll.u32 %s1100_s27, 4  ;;  %s606_s8 = int_to_ptr.vmem [resolvable:$true] %s605_s8 }
 0x22b   : > { %s1170_s7 = scalar_lea.hbm %s1225_s5, %s704_s16  ;;  %s593_s11 = scalar_lea.sflag [#allocation4], %s238_s10 }
 0x22c   : > { %s890_s12 = scalar_lea.vmem %s606_s8, 16  ;;  %s989_s13 = smov [#allocation3]  }
 0x22d   : > { %p891_p2 = scmp.ne.s32.totalorder %s606_s8, %s890_s12  ;;  %s894_s21 = sshll.u32 %s989_s13, 4  ;;  %s895_s21 = int_to_ptr.vmem [resolvable:$false] %s894_s21 }
 0x22e   : > { %s896_s14 = scalar_lea.vmem %s895_s21, 32  ;;  %p897_p6 = scmp.lt.s32.totalorder %s606_s8, %s895_s21 }
 0x22f   : > { %p892_p4 = pnand %p891_p2, %p1069_p3  ;;  %p898_p7 = scmp.lt.s32.totalorder %s896_s14, %s890_s12 }
 0x231   : > { %p893_p5 = pneg %p892_p4  ;;  %p899_p8 = por %p898_p7, %p897_p6 }
 0x233   : > { %p900_p10 = pnand %p899_p8, %p893_p5 }
 0x235   : > { %903 = shalt.err (!%p900_p10)
}
 0x236   : > { %s904_s22 = scalar_lea.hbm %s1170_s7, 16  ;;  %s908_s15 = scalar_lea.hbm %s1225_s5, 32 }
 0x237   : > { %p905_p11 = scmp.ne.s32.totalorder %s1170_s7, %s904_s22  ;;  %p909_p0 = scmp.lt.u32.totalorder %s1170_s7, %s1225_s5 }
 0x238   : > { %p910_p1 = scmp.lt.u32.totalorder %s908_s15, %s904_s22  ;;  %p912_p4 = scmp.lt.u32.totalorder %s904_s22, %s1170_s7 }
 0x239   : > { %p906_p12 = pnand %p905_p11, %p1069_p3 }
 0x23a   : > { %p911_p2 = por %p910_p1, %p909_p0 }
 0x23b   : > { %p907_p13 = pneg %p906_p12 }
 0x23c   : > { %p913_p5 = por %p912_p4, %p911_p2 }
 0x23e   : > { %p914_p6 = pnand %p913_p5, %p907_p13 }
 0x240   : > { %917 = shalt.err (!%p914_p6)
}
 0x241   : > { %800 = dma.vmem_to_hbm [thread:$0]  (%p1069_p3), %s606_s8, 16, %s1170_s7, %s593_s11  }
 0x242 PF: > { %p806_p7 = scmp.ge.s32.totalorder %s984_s25, 2  ;;  %s617_s26 = sand.u32 1, %s956_s18  }
 0x243   : > { %s618_s12 = scalar_lea.sflag [#allocation4], %s617_s26 }
 0x244   : > { %p803_p8 = pnand %p806_p7, %p1079_p9 }
 0x246   : > { %951 = dma.done.wait (!%p803_p8), %s618_s12, 16  }
 0x247   : > { %953 = vsyncadd (!%p803_p8), %s618_s12, 4294967280  ;;  %s18_s25 = sadd.s32 1, %s984_s25   ;;  %s1228_s18 = smov %s960_s19 }
 0x248   : > { %p15_p10 = scmp.ge.s32.totalorder %s18_s25, 6   ;;  %s1229_s19 = smov %s964_s20 }
 0x249   : > { %s1230_s20 = smov %s1087_s9  ;;  %s1231_s21 = smov %s976_s23 }
 0x24a   : > { %s1232_s22 = smov %s980_s24  ;;  %s1233_s23 = smov %s1236_s28 }
 0x24b   : > { %s1234_s24 = smov %s1240_s29  ;;  %17 = sbr.rel (!%p15_p10) target bundleno = 5 (0x5), region = 83 }
 0x252   :  { %622 = vsyncpa [#allocation4], 1 }
 0x253   :  { %624 = vsyncpa [#allocation4 + $0x1], 1 }

</bundles_post_ra>
